<compile_context>
chip_gen: v6e
topology: v6e:2x2x1
jax: 0.10.0
libtpu: 0.0.40
codegen_flags: <defaults>
</compile_context>

<pallas_src>
import math

import jax
import jax.numpy as jnp
from jax.experimental import pallas as pl
from jax.experimental.pallas import tpu as pltpu


_HAS_BUFFERED = hasattr(pl, "Buffered")


def _add_kernel(a_ref, b_ref, o_ref):
    # Elementwise add on the current VMEM tile (VPU).
    o_ref[...] = a_ref[...] + b_ref[...]


def _cdiv(a: int, b: int) -> int:
    return -(-a // b)


def _vmem_capacity_bytes() -> int:
    try:
        return int(pltpu.get_tpu_info().vmem_capacity_bytes)
    except Exception:
        # Conservative default: v7x per-TensorCore VMEM.
        return 64 << 20


def _sublane_multiple(dtype) -> int:
    # Sub-32-bit dtypes pack along sublanes: f32 -> 8, bf16 -> 16, int8 -> 32.
    return max(8, 32 // jnp.dtype(dtype).itemsize)


def _plan_tm(rows: int, row_bytes: int, sub: int, block_bytes: int,
             target_programs: int, want_even: bool) -> int:
    """Rows per block: byte-budgeted, >= target_programs blocks when possible,
    and (best-effort) an even block count on two-TensorCore parts."""
    if rows <= sub:
        return rows
    n_chunks = _cdiv(rows, sub)                                 # sub-row granules
    max_cpp = max(1, min(n_chunks, block_bytes // (sub * row_bytes)))
    desired = min(target_programs, n_chunks)
    best = None
    best_even = None
    for cpp in range(max_cpp, 0, -1):
        progs = _cdiv(n_chunks, cpp)
        if progs < desired:
            continue
        if best is None:
            best = cpp                                          # largest tile meeting target
        if progs % 2 == 0:
            best_even = cpp
            break
        if progs >= 2 * desired:                                # don't over-shrink tiles
            break
    if best is None:
        best = max_cpp
    cpp = best_even if (want_even and best_even is not None) else best
    return min(rows, cpp * sub)


def _in_spec(tm: int, tn: int, buffer_count: int) -> pl.BlockSpec:
    if buffer_count > 2 and _HAS_BUFFERED:
        try:
            return pl.BlockSpec((tm, tn), lambda i, j: (i, j),
                                pipeline_mode=pl.Buffered(buffer_count))
        except TypeError:
            pass
    return pl.BlockSpec((tm, tn), lambda i, j: (i, j))


def pallas_add(a: jax.Array, b: jax.Array, *, force_pallas: bool = False) -> jax.Array:
    assert a.shape == b.shape and a.dtype == b.dtype
    orig_shape = a.shape
    dtype = a.dtype
    itemsize = jnp.dtype(dtype).itemsize
    total = int(a.size)

    if total == 0:
        return jnp.zeros(orig_shape, dtype)

    vmem_cap = _vmem_capacity_bytes()
    is_v7x_like = vmem_cap <= (64 << 20)   # 64 MiB VMEM => v7x-class (2 TCs, 3.2 TB/s HBM)

    # Tiny tensors: launch/DMA-setup dominates; XLA fuses the add for free. The
    # crossover is higher on v7x because the stream itself is ~1 us.
    tiny_bytes = (1 << 20) if is_v7x_like else (256 << 10)
    if not force_pallas and total * itemsize < tiny_bytes:
        return a + b

    sub = _sublane_multiple(dtype)

    # Per-generation block budget / input pipeline depth.
    block_bytes = (6 << 20) if is_v7x_like else (3 << 20)
    in_buffers = 2 if is_v7x_like else 3          # Buffered(3) inputs on v5e/v6e
    target_programs = 6 if is_v7x_like else 4     # >= 2-3 blocks per TensorCore
    want_even = is_v7x_like                       # balance v7x's two TensorCores

    # Lane-dense 2-D slab: last dim a multiple of 128 whenever possible so all
    # stores are full-width unmasked `vst`s and per-block DMA is contiguous.
    if total % 128 == 0:
        rows, cols = total // 128, 128
    elif len(orig_shape) >= 2:
        rows, cols = math.prod(orig_shape[:-1]), orig_shape[-1]
    else:
        rows, cols = 1, total

    # Guard the non-multiple-of-128 path: the minimal legal block is full-width
    # along the last dim, so if that already blows the budget, bail to XLA.
    # TODO(synk): padding the last dim up to a multiple of 128 would restore
    # tiling here, but costs an extra full copy pass for a pure-bandwidth op.
    min_block_rows = min(rows, sub)
    if cols % 128 != 0 and min_block_rows * cols * itemsize > 2 * block_bytes:
        return a + b

    a2 = a.reshape(rows, cols)
    b2 = b.reshape(rows, cols)

    tn = cols
    tm = _plan_tm(rows, tn * itemsize, sub, block_bytes, target_programs, want_even)

    tile_bytes = tm * tn * itemsize
    # Explicit scoped-VMEM budget: 2 inputs x in_buffers + 1 output x 2 buffers,
    # plus ~4 MiB headroom; keep it well under physical VMEM (<= 3/4 of capacity).
    vmem_limit = (2 * in_buffers + 2) * tile_bytes + (4 << 20)
    vmem_limit = min(max(vmem_limit, 32 << 20), int(vmem_cap * 3 // 4))

    grid = (_cdiv(rows, tm), _cdiv(cols, tn))

    out2 = pl.pallas_call(
        _add_kernel,
        out_shape=jax.ShapeDtypeStruct((rows, cols), dtype),
        grid=grid,
        in_specs=[_in_spec(tm, tn, in_buffers), _in_spec(tm, tn, in_buffers)],
        out_specs=pl.BlockSpec((tm, tn), lambda i, j: (i, j)),
        compiler_params=pltpu.CompilerParams(
            dimension_semantics=("parallel", "parallel"),
            vmem_limit_bytes=vmem_limit,
        ),
        cost_estimate=pl.CostEstimate(
            flops=total,
            transcendentals=0,
            bytes_accessed=3 * total * itemsize,
        ),
    )(a2, b2)

    return out2.reshape(orig_shape)


if __name__ == "__main__":
    key = jax.random.PRNGKey(0)
    k1, k2, k3, k4 = jax.random.split(key, 4)

    # Case 1: the module's small test shape (seq=8, hidden=32), f32.
    # 8*32 = 256 elements -> reshaped to a lane-dense (2, 128) slab.
    a = jax.random.normal(k1, (8, 32), dtype=jnp.float32)
    b = jax.random.normal(k2, (8, 32), dtype=jnp.float32)
    out = pallas_add(a, b, force_pallas=True)
    jax.block_until_ready(out)
    assert out.shape == (8, 32)
    assert jnp.allclose(out, a + b, atol=1e-6), "mismatch vs reference (case 1)"

    # Case 2: larger shape exercising byte-budgeted tiling + multi-program grid
    # (>= 4 programs, even count on v7x-class parts, Buffered(3) inputs on v5e/v6e).
    a2 = jax.random.normal(k3, (512, 1024), dtype=jnp.float32)
    b2 = jax.random.normal(k4, (512, 1024), dtype=jnp.float32)
    out2 = pallas_add(a2, b2, force_pallas=True)
    jax.block_until_ready(out2)
    assert jnp.allclose(out2, a2 + b2, atol=1e-6), "mismatch vs reference (case 2)"

    # Case 3: last dim not a multiple of 128 (full-array block path, guarded).
    a3 = jax.random.normal(k1, (5, 33), dtype=jnp.float32)
    b3 = jax.random.normal(k2, (5, 33), dtype=jnp.float32)
    out3 = pallas_add(a3, b3, force_pallas=True)
    jax.block_until_ready(out3)
    assert jnp.allclose(out3, a3 + b3, atol=1e-6), "mismatch vs reference (case 3)"

    print("KERNEL_OK")
</pallas_src>

<mosaic_0001>
module attributes {stable_mosaic.version = 11 : i64} {
  func.func @_add_kernel(%arg0: i32, %arg1: i32, %arg2: memref<2x128xf32, #tpu.memory_space<vmem>>, %arg3: memref<2x128xf32, #tpu.memory_space<vmem>>, %arg4: memref<2x128xf32, #tpu.memory_space<vmem>>) attributes {dimension_semantics = [#tpu.dimension_semantics<parallel>, #tpu.dimension_semantics<parallel>], iteration_bounds = array<i64: 1, 1>, scalar_prefetch = 0 : i64, scratch_operands = 0 : i64, tpu.core_type = #tpu.core_type<tc>, window_params = [{transform_indices = @transform_0, window_bounds = array<i64: 2, 128>}, {transform_indices = @transform_1, window_bounds = array<i64: 2, 128>}, {transform_indices = @transform_2, window_bounds = array<i64: 2, 128>}]} {
    %c0 = arith.constant 0 : index
    %c0_0 = arith.constant 0 : index
    %0 = vector.load %arg2[%c0, %c0_0] : memref<2x128xf32, #tpu.memory_space<vmem>>, vector<2x128xf32>
    %c0_1 = arith.constant 0 : index
    %c0_2 = arith.constant 0 : index
    %1 = vector.load %arg3[%c0_1, %c0_2] : memref<2x128xf32, #tpu.memory_space<vmem>>, vector<2x128xf32>
    %2 = arith.addf %0, %1 : vector<2x128xf32>
    %c0_3 = arith.constant 0 : index
    %c0_4 = arith.constant 0 : index
    %3 = vector.load %arg4[%c0_3, %c0_4] : memref<2x128xf32, #tpu.memory_space<vmem>>, vector<2x128xf32>
    tpu.vector_store %arg4[%c0_3, %c0_4], %2 {strides = array<i32>} : memref<2x128xf32, #tpu.memory_space<vmem>>, vector<2x128xf32>,
    return
  }
  func.func @transform_0(%arg0: i32, %arg1: i32) -> (i32, i32) {
    %c0_i32 = arith.constant 0 : i32
    return %arg0, %arg1 : i32, i32
  }
  func.func @transform_1(%arg0: i32, %arg1: i32) -> (i32, i32) {
    %c0_i32 = arith.constant 0 : i32
    return %arg0, %arg1 : i32, i32
  }
  func.func @transform_2(%arg0: i32, %arg1: i32) -> (i32, i32) {
    %c0_i32 = arith.constant 0 : i32
    return %arg0, %arg1 : i32, i32
  }
}

</mosaic_0001>

<bundles_post_ra>
// kernel: tpu_custom_call.1
= control target key start
LH: loop header
LB: loop body
LE: loop exit
PB: predicated region body
PF: predicated region fallthrough
CT: control target
= control target key end

     0   :  { %7 = vsyncpa [#allocation3], 0  ;;  %s152_s0 = inlined_call_operand.hbm [shape: f32[2,128], index: 0, kind: input, shape index: {}]   ;;  %s153_s1 = inlined_call_operand.hbm [shape: f32[2,128], index: 1, kind: input, shape index: {}]   ;;  %s154_s2 = inlined_call_operand.hbm [shape: f32[2,128], index: 2, kind: output, shape index: {}]  }
   0x1   :  { %8 = vsyncpa [#allocation6], 0 }
   0x2   :  { %9 = vsyncpa [#allocation4], 0  ;;  %s125_s9 = smov [#allocation2]   ;;  %s126_s11 = smov [#allocation5]  }
   0x3   :  { %s16_s10 = sshll.u32 %s125_s9, 4  ;;  %s26_s12 = sshll.u32 %s126_s11, 4  ;;  %s17_s10 = int_to_ptr.vmem [resolvable:$true] %s16_s10  ;;  %s27_s12 = int_to_ptr.vmem [resolvable:$true] %s26_s12 }
   0x4   :  { %s67_s13 = scalar_lea.vmem %s17_s10, 32  ;;  %p72_p1 = scmp.lt.s32.totalorder %s17_s10, %s17_s10 }
   0x5   :  { %p68_p0 = scmp.ne.s32.totalorder %s17_s10, %s67_s13  ;;  %p73_p2 = scmp.lt.s32.totalorder %s67_s13, %s67_s13 }
   0x7   :  { %p74_p3 = por %p73_p2, %p72_p1 }
   0x9   :  { %p75_p4 = pnand %p74_p3, %p68_p0 }
   0xb   :  { %78 = shalt.err (!%p75_p4)
}
   0xc   :  { %19 = dma.hbm_to_vmem [thread:$0]  %s152_s0, 32, %s17_s10, [#allocation3]  }
   0xd   :  { %s87_s16 = scalar_lea.vmem %s27_s12, 32  ;;  %p92_p6 = scmp.lt.s32.totalorder %s27_s12, %s27_s12 }
   0xe   :  { %p88_p5 = scmp.ne.s32.totalorder %s27_s12, %s87_s16  ;;  %p93_p7 = scmp.lt.s32.totalorder %s87_s16, %s87_s16 }
  0x10   :  { %p94_p8 = por %p93_p7, %p92_p6 }
  0x12   :  { %p95_p9 = pnand %p94_p8, %p88_p5 }
  0x14   :  { %98 = shalt.err (!%p95_p9)
}
  0x15   :  { %29 = dma.hbm_to_vmem [thread:$0]  %s153_s1, 32, %s27_s12, [#allocation6]  }
  0x16   :  { %119 = dma.done.wait [#allocation3], 32  }
  0x17   :  { %120 = vsyncadd [#allocation3], 4294967264 }
  0x18   :  { %121 = dma.done.wait [#allocation6], 32  }
  0x19   :  { %122 = vsyncadd [#allocation6], 4294967264  ;;  %s127_s19 = smov [#allocation7]   ;;  %v36_v0 = vld [vmem:[#allocation2] sm:$0x3] }
  0x1a   :  { %s46_s20 = sshll.u32 %s127_s19, 4  ;;  %v37_v1 = vld [vmem:[#allocation5] sm:$0x3]  ;;  %s47_s20 = int_to_ptr.vmem [resolvable:$true] %s46_s20 }
  0x1b   :  { %v38_v2 = vadd.f32 %v37_v1, %v36_v0  ;;  %s99_s0 = scalar_lea.vmem %s47_s20, 32  ;;  %p104_p11 = scmp.lt.s32.totalorder %s47_s20, %s47_s20 }
  0x1c   :  { %p100_p10 = scmp.ne.s32.totalorder %s47_s20, %s99_s0  ;;  %p105_p12 = scmp.lt.s32.totalorder %s99_s0, %s99_s0 }
  0x1d   :  { %39 = vst [vmem:[#allocation7] sm:$0x3] %v38_v2 }
  0x1e   :  { %p106_p13 = por %p105_p12, %p104_p11 }
  0x20   :  { %p107_p0 = pnand %p106_p13, %p100_p10 }
  0x22   :  { %110 = shalt.err (!%p107_p0)
}
  0x23   :  { %49 = dma.vmem_to_hbm [thread:$0]  %s47_s20, 32, %s154_s2, [#allocation4]  }
  0x24   :  { %123 = dma.done.wait [#allocation4], 32  }
  0x25   :  { %124 = vsyncadd [#allocation4], 4294967264 }
  0x26   :  { %53 = vsyncpa [#allocation3], 1 }
  0x27   :  { %54 = vsyncpa [#allocation6], 1 }
  0x28   :  { %55 = vsyncpa [#allocation4], 1 }

</bundles_post_ra>
